<compile_context>
chip_gen: v7x
topology: tpu7x:2x2x1
jax: 0.10.0
libtpu: 0.0.40
codegen_flags: <defaults>
</compile_context>

<pallas_src>
import functools

import jax
import jax.numpy as jnp
from jax.experimental import pallas as pl
from jax.experimental.pallas import tpu as pltpu

# Tile caps (re-derived per call from the real dims; these are upper bounds).
_TM_CAP = 512
_TN_CAP = 512
_TK_CAP = 2048


def _round_up(x: int, m: int) -> int:
    return ((x + m - 1) // m) * m


def _largest_divisor_tile(d: int, align: int, cap: int) -> int:
    """Largest multiple of `align` that divides `d` and is <= cap."""
    cap = min(cap, d)
    best = align
    t = align
    while t <= cap:
        if d % t == 0:
            best = t
        t += align
    return best


def _m_align_for(compute_dtype) -> int:
    # Sub-32-bit dtypes pack rows along sublanes: keep M tiles full.
    return {1: 32, 2: 16, 4: 8}[jnp.dtype(compute_dtype).itemsize]


def _plan_kn(in_features: int, out_features: int):
    """(tk, tn, Kp, Np) — depends only on the (static) weight dims."""
    Kp = _round_up(in_features, 128)
    Np = _round_up(out_features, 128)
    tk = _largest_divisor_tile(Kp, 128, _TK_CAP)
    # Ensure >=2 tiles along N whenever possible so both v7x TensorCores get
    # work even when the batch fits a single M tile (harmless on v5e/v6e).
    tn_limit = _TN_CAP if Np <= 128 else min(_TN_CAP, Np // 2)
    tn = _largest_divisor_tile(Np, 128, max(128, tn_limit))
    return tk, tn, Kp, Np


def _plan_m(batch: int, m_align: int):
    Mp = _round_up(batch, m_align)
    tm = _largest_divisor_tile(Mp, m_align, _TM_CAP)
    return tm, Mp


def prepare_weights(weights_flat, in_features: int, out_features: int,
                    compute_dtype=jnp.bfloat16):
    """One-time weight prep: reshape flat param, pad to tile-aligned (Kp, Np),
    cast to the compute dtype. Do this ONCE at init, not per forward call."""
    assert weights_flat.shape == (in_features * out_features,)
    _, _, Kp, Np = _plan_kn(in_features, out_features)
    w = weights_flat.reshape(in_features, out_features)
    if (Kp, Np) != (in_features, out_features):
        w = jnp.pad(w, ((0, Kp - in_features), (0, Np - out_features)))
    return w.astype(compute_dtype)


def _matmul_kernel(x_ref, w_ref, o_ref, acc_ref):
    """One (tm, tn) output tile; accumulate in f32 over the K grid axis."""
    k = pl.program_id(2)

    @pl.when(k == 0)
    def _():
        acc_ref[...] = jnp.zeros_like(acc_ref)

    acc_ref[...] += jnp.dot(
        x_ref[...], w_ref[...], preferred_element_type=jnp.float32
    )

    @pl.when(k == pl.num_programs(2) - 1)
    def _():
        o_ref[...] = acc_ref[...].astype(o_ref.dtype)


@functools.partial(
    jax.jit,
    static_argnames=("in_features", "out_features", "compute_dtype", "out_dtype"),
)
def single_custom_layer_forward(x, w_prepared, *, in_features, out_features,
                                compute_dtype=jnp.bfloat16, out_dtype=None):
    """Pallas equivalent of single_custom_layer.forward (agf = custom linear).

    x:          [batch, in_features]
    w_prepared: [Kp, Np] weight already padded/cast by `prepare_weights`.
    """
    M, K = x.shape
    assert K == in_features
    tk, tn, Kp, Np = _plan_kn(in_features, out_features)
    assert w_prepared.shape == (Kp, Np), (w_prepared.shape, (Kp, Np))
    assert w_prepared.dtype == jnp.dtype(compute_dtype)

    out_dtype = out_dtype or x.dtype
    m_align = _m_align_for(compute_dtype)
    tm, Mp = _plan_m(M, m_align)

    # Per-call activation prep (cheap: x is small relative to W for inference).
    x = x.astype(compute_dtype)
    if (Mp, Kp) != (M, K):
        x = jnp.pad(x, ((0, Mp - M), (0, Kp - K)))

    grid = (Mp // tm, Np // tn, Kp // tk)  # reduction (K) axis last

    csize = jnp.dtype(compute_dtype).itemsize
    osize = jnp.dtype(out_dtype).itemsize

    # Double-buffered VMEM footprint: 2 bufs per input + 2 per output + f32 acc.
    footprint = 2 * (tm * tk + tk * tn) * csize + 2 * tm * tn * osize + tm * tn * 4
    vmem_limit = int(min(64 * 2**20, max(32 * 2**20, 2 * footprint)))

    # Bytes include re-reads: x re-read Np/tn times, W re-read Mp/tm times.
    cost = pl.CostEstimate(
        flops=2 * Mp * Np * Kp,
        transcendentals=0,
        bytes_accessed=(Mp * Kp * csize) * grid[1]
        + (Kp * Np * csize) * grid[0]
        + Mp * Np * osize,
    )

    y_padded = pl.pallas_call(
        _matmul_kernel,
        out_shape=jax.ShapeDtypeStruct((Mp, Np), out_dtype),
        grid_spec=pltpu.PrefetchScalarGridSpec(
            num_scalar_prefetch=0,
            grid=grid,
            in_specs=[
                pl.BlockSpec((tm, tk), lambda i, j, k: (i, k)),
                pl.BlockSpec((tk, tn), lambda i, j, k: (k, j)),
            ],
            out_specs=pl.BlockSpec((tm, tn), lambda i, j, k: (i, j)),
            scratch_shapes=[pltpu.VMEM((tm, tn), jnp.float32)],
        ),
        compiler_params=pltpu.CompilerParams(
            dimension_semantics=("parallel", "parallel", "arbitrary"),
            vmem_limit_bytes=vmem_limit,
        ),
        cost_estimate=cost,
    )(x, w_prepared)

    return y_padded[:M, :out_features]


def single_custom_layer_apply(x, weights_flat, *, in_features, out_features,
                              compute_dtype=jnp.bfloat16):
    """Convenience wrapper matching the torch module call signature
    (flat weight in, prep + forward). Prefer prepare_weights() once at init."""
    w = prepare_weights(weights_flat, in_features, out_features, compute_dtype)
    return single_custom_layer_forward(
        x, w, in_features=in_features, out_features=out_features,
        compute_dtype=compute_dtype)


if __name__ == "__main__":
    key = jax.random.PRNGKey(0)
    k1, k2, k3, k4 = jax.random.split(key, 4)

    # --- Test 1: module-sized small shapes, default bf16 compute path. -----
    in_features, out_features, batch = 32, 32, 8
    x = jax.random.normal(k1, (batch, in_features), dtype=jnp.float32)
    # The torch module inits the parameter to zeros; use deterministic random
    # values so the kernel output is non-trivially checkable.
    w_flat = jax.random.normal(
        k2, (in_features * out_features,), dtype=jnp.float32
    )

    w_prep = prepare_weights(w_flat, in_features, out_features)  # once, at init
    y = single_custom_layer_forward(
        x, w_prep, in_features=in_features, out_features=out_features
    )
    y = jax.block_until_ready(y)
    y_ref = x @ w_flat.reshape(in_features, out_features)
    assert y.shape == (batch, out_features)
    assert jnp.allclose(y, y_ref, atol=1e-1, rtol=5e-2)

    # --- Test 2: f32 compute path, tight numerical check. -------------------
    w_prep_f32 = prepare_weights(w_flat, in_features, out_features,
                                 compute_dtype=jnp.float32)
    y_f32 = single_custom_layer_forward(
        x, w_prep_f32, in_features=in_features, out_features=out_features,
        compute_dtype=jnp.float32,
    )
    y_f32 = jax.block_until_ready(y_f32)
    assert jnp.allclose(y_f32, y_ref, atol=1e-5, rtol=1e-5)

    # --- Test 3: multi-tile shapes exercising the 3-D grid (bf16 default). --
    in2, out2, batch2 = 256, 384, 64
    x2 = jax.random.normal(k3, (batch2, in2), dtype=jnp.float32)
    w2_flat = jax.random.normal(k4, (in2 * out2,), dtype=jnp.float32)

    w2_prep = prepare_weights(w2_flat, in2, out2)
    y2 = single_custom_layer_forward(
        x2, w2_prep, in_features=in2, out_features=out2
    )
    y2 = jax.block_until_ready(y2)
    y2_ref = x2 @ w2_flat.reshape(in2, out2)
    assert y2.shape == (batch2, out2)
    assert jnp.allclose(y2, y2_ref, atol=2.5e-1, rtol=2.5e-2)

    print("KERNEL_OK")
</pallas_src>

<mosaic_0001>
module attributes {stable_mosaic.version = 11 : i64} {
  func.func @_matmul_kernel(%arg0: i32, %arg1: i32, %arg2: i32, %arg3: memref<16x128xbf16, #tpu.memory_space<vmem>>, %arg4: memref<128x128xbf16, #tpu.memory_space<vmem>>, %arg5: memref<16x128xf32, #tpu.memory_space<vmem>>, %arg6: memref<16x128xf32, #tpu.memory_space<vmem>>) attributes {dimension_semantics = [#tpu.dimension_semantics<parallel>, #tpu.dimension_semantics<parallel>, #tpu.dimension_semantics<arbitrary>], iteration_bounds = array<i64: 1, 1, 1>, scalar_prefetch = 0 : i64, scratch_operands = 1 : i64, tpu.core_type = #tpu.core_type<tc>, window_params = [{transform_indices = @transform_0, window_bounds = array<i64: 16, 128>}, {transform_indices = @transform_1, window_bounds = array<i64: 128, 128>}, {transform_indices = @transform_2, window_bounds = array<i64: 16, 128>}]} {
    %c0_i32 = arith.constant 0 : i32
    %0 = arith.cmpi eq, %arg2, %c0_i32 : i32
    %1 = arith.extui %0 : i1 to i32
    %c0_i32_0 = arith.constant 0 : i32
    %2 = arith.cmpi ne, %1, %c0_i32_0 : i32
    scf.if %2 {
      %cst_10 = arith.constant 0.000000e+00 : f32
      %12 = vector.broadcast %cst_10 : f32 to vector<16x128xf32>
      %c0_11 = arith.constant 0 : index
      %c0_12 = arith.constant 0 : index
      %13 = vector.load %arg6[%c0_11, %c0_12] : memref<16x128xf32, #tpu.memory_space<vmem>>, vector<16x128xf32>
      tpu.vector_store %arg6[%c0_11, %c0_12], %12 {strides = array<i32>} : memref<16x128xf32, #tpu.memory_space<vmem>>, vector<16x128xf32>,
    } else {
    }
    %c0 = arith.constant 0 : index
    %c0_1 = arith.constant 0 : index
    %3 = vector.load %arg6[%c0, %c0_1] : memref<16x128xf32, #tpu.memory_space<vmem>>, vector<16x128xf32>
    %c0_2 = arith.constant 0 : index
    %c0_3 = arith.constant 0 : index
    %4 = vector.load %arg3[%c0_2, %c0_3] : memref<16x128xbf16, #tpu.memory_space<vmem>>, vector<16x128xbf16>
    %c0_4 = arith.constant 0 : index
    %c0_5 = arith.constant 0 : index
    %5 = vector.load %arg4[%c0_4, %c0_5] : memref<128x128xbf16, #tpu.memory_space<vmem>>, vector<128x128xbf16>
    %cst = arith.constant dense<0.000000e+00> : vector<16x128xf32>
    %6 = tpu.matmul %4, %5, %cst {dimension_numbers = #tpu.dot_dimension_numbers<[1], [0], [0], [1], [0, 0, 1, 1], [], []>} : vector<16x128xbf16>, vector<128x128xbf16>, vector<16x128xf32> -> vector<16x128xf32>
    %7 = arith.addf %3, %6 : vector<16x128xf32>
    %c0_6 = arith.constant 0 : index
    %c0_7 = arith.constant 0 : index
    %8 = vector.load %arg6[%c0_6, %c0_7] : memref<16x128xf32, #tpu.memory_space<vmem>>, vector<16x128xf32>
    tpu.vector_store %arg6[%c0_6, %c0_7], %7 {strides = array<i32>} : memref<16x128xf32, #tpu.memory_space<vmem>>, vector<16x128xf32>,
    %c0_i32_8 = arith.constant 0 : i32
    %9 = arith.cmpi eq, %arg2, %c0_i32_8 : i32
    %10 = arith.extui %9 : i1 to i32
    %c0_i32_9 = arith.constant 0 : i32
    %11 = arith.cmpi ne, %10, %c0_i32_9 : i32
    scf.if %11 {
      %c0_10 = arith.constant 0 : index
      %c0_11 = arith.constant 0 : index
      %12 = vector.load %arg6[%c0_10, %c0_11] : memref<16x128xf32, #tpu.memory_space<vmem>>, vector<16x128xf32>
      %c0_12 = arith.constant 0 : index
      %c0_13 = arith.constant 0 : index
      %13 = vector.load %arg5[%c0_12, %c0_13] : memref<16x128xf32, #tpu.memory_space<vmem>>, vector<16x128xf32>
      tpu.vector_store %arg5[%c0_12, %c0_13], %12 {strides = array<i32>} : memref<16x128xf32, #tpu.memory_space<vmem>>, vector<16x128xf32>,
    } else {
    }
    return
  }
  func.func @transform_0(%arg0: i32, %arg1: i32, %arg2: i32) -> (i32, i32) {
    %c0_i32 = arith.constant 0 : i32
    return %arg0, %arg2 : i32, i32
  }
  func.func @transform_1(%arg0: i32, %arg1: i32, %arg2: i32) -> (i32, i32) {
    %c0_i32 = arith.constant 0 : i32
    return %arg2, %arg1 : i32, i32
  }
  func.func @transform_2(%arg0: i32, %arg1: i32, %arg2: i32) -> (i32, i32) {
    %c0_i32 = arith.constant 0 : i32
    return %arg0, %arg1 : i32, i32
  }
}

</mosaic_0001>

<bundles_post_ra>
// kernel: single_custom_layer_forward.1
= control target key start
LH: loop header
LB: loop body
LE: loop exit
PB: predicated region body
PF: predicated region fallthrough
CT: control target
= control target key end

     0   :  { %7 = vsyncpa [#allocation4], 0  ;;  %s239_s9 = smov [#allocation3]   ;;  %s280_s0 = inlined_call_operand.vmem [shape: bf16[16,128], index: 0, kind: input, shape index: {}]   ;;  %s281_s1 = inlined_call_operand.hbm [shape: bf16[128,128], index: 1, kind: input, shape index: {}]   ;;  %s282_s2 = inlined_call_operand.vmem [shape: f32[16,128], index: 2, kind: output, shape index: {}]  }
   0x1   :  { %s15_s10 = sshll.u32 %s239_s9, 4  ;;  %s215_s13 = scalar_lea.hbm %s281_s1, 1024  ;;  %s16_s10 = int_to_ptr.vmem [resolvable:$true] %s15_s10 }
   0x2   :  { %p216_p0 = scmp.ne.s32.totalorder %s281_s1, %s215_s13  ;;  %p219_p1 = scmp.lt.u32.totalorder %s215_s13, %s281_s1 }
   0x4   :  { %p221_p2 = pnand %p219_p1, %p216_p0 }
   0x6   :  { %224 = shalt.err (!%p221_p2)
}
   0x7   :  { %s225_s18 = scalar_lea.vmem %s16_s10, 1024  ;;  %p230_p4 = scmp.lt.s32.totalorder %s16_s10, %s16_s10 }
   0x8   :  { %p226_p3 = scmp.ne.s32.totalorder %s16_s10, %s225_s18  ;;  %p231_p5 = scmp.lt.s32.totalorder %s225_s18, %s225_s18 }
   0xa   :  { %p232_p6 = por %p231_p5, %p230_p4 }
   0xc   :  { %p233_p7 = pnand %p232_p6, %p226_p3 }
   0xe   :  { %236 = shalt.err (!%p233_p7)
}
   0xf   :  { %s240_s19 = smov 64   ;;  %s241_s20 = smov 4  }
  0x10   :  { %21 = dma.hbm_to_vmem [thread:$0]  %s281_s1, 1024, %s16_s10, [#allocation4], %s240_s19, %s240_s19, %s241_s20  }
  0x11   :  { %237 = dma.done.wait [#allocation4], 1024  }
  0x12   :  { %238 = vsyncadd [#allocation4], 4294966272  ;;  %v242_v0 = vmov 0.0   ;;  %vm243_vm0 = vmmov 0   ;;  %v206_v1 = vld [vmem:[#allocation3] sm:$0xff]   ;;  %v207_v2 = vld [vmem:[#allocation3 + $0x8] sm:$0xff]  }
  0x13   :  { %181 = vmatprep.subr.bf16.mxu0 %v242_v0  ;;  %197 = vmatprep.mubr.msk.bf16.mxu0 %vm243_vm0, %v242_v0  ;;  %v208_v3 = vld [vmem:[#allocation3 + $0x10] sm:$0xff]   ;;  %v209_v4 = vld [vmem:[#allocation3 + $0x18] sm:$0xff]   ;;  %v210_v5 = vld [vmem:[#allocation3 + $0x20] sm:$0xff]  }
  0x14   :  { %182 = vmatpush3.bf16.msra.mxu0 %v206_v1  ;;  %v211_v6 = vld [vmem:[#allocation3 + $0x28] sm:$0xff]   ;;  %v212_v7 = vld [vmem:[#allocation3 + $0x30] sm:$0xff]   ;;  %v213_v8 = vld [vmem:[#allocation3 + $0x38] sm:$0xff]  }
  0x15   :  { %183 = vmatprep.subr.bf16.mxu0 %v242_v0  ;;  %v214_v9 = vld [vmem:[%s280_s0] sm:$0xff]  }
  0x18   :  { %184 = vmatpush3.bf16.msra.mxu0 %v207_v2 }
  0x19   :  { %185 = vmatprep.subr.bf16.mxu0 %v242_v0 }
  0x1c   :  { %186 = vmatpush3.bf16.msra.mxu0 %v208_v3 }
  0x1d   :  { %187 = vmatprep.subr.bf16.mxu0 %v242_v0 }
  0x20   :  { %188 = vmatpush3.bf16.msra.mxu0 %v209_v4 }
  0x21   :  { %189 = vmatprep.subr.bf16.mxu0 %v242_v0 }
  0x24   :  { %190 = vmatpush3.bf16.msra.mxu0 %v210_v5 }
  0x25   :  { %191 = vmatprep.subr.bf16.mxu0 %v242_v0 }
  0x28   :  { %192 = vmatpush3.bf16.msra.mxu0 %v211_v6 }
  0x29   :  { %193 = vmatprep.subr.bf16.mxu0 %v242_v0 }
  0x2c   :  { %194 = vmatpush3.bf16.msra.mxu0 %v212_v7 }
  0x2d   :  { %195 = vmatprep.subr.bf16.mxu0 %v242_v0 }
  0x30   :  { %196 = vmatpush3.bf16.msra.mxu0 %v213_v8 }
  0x33   :  { %198 = vmatmul.mubr.bf16.vlgmr.msra.gmra.mrb[0].mxu0 %v214_v9 }
 0x106   :  { %v140_v10 = vpop.f32.mrb[0].mxu0 }
 0x107   :  { %156 = vst [vmem:[%s282_s2] sm:$0xff] %v140_v10  ;;  %v199_v11 = vpop.f32.mrb[1].mxu0 }
 0x108   :  { %v143_v12 = vpop.f32.mrb[2].mxu0 }
 0x109   :  { %157 = vst [vmem:[%s282_s2 + $0x8] sm:$0xff] %v143_v12  ;;  %v200_v13 = vpop.f32.mrb[3].mxu0 }
 0x10a   :  { %162 = vsyncpa [#allocation4], 1 }

</bundles_post_ra>
